<compile_context>
chip_gen: v5e
topology: v5e:2x2
jax: 0.10.0
libtpu: 0.0.40
codegen_flags: <defaults>
</compile_context>

<pallas_src>
import jax
import jax.numpy as jnp
from jax.experimental import pallas as pl
from jax.experimental.pallas import tpu as pltpu


def _round_up(x, m):
    return ((x + m - 1) // m) * m


def se_embedding_kernel(x_ref, wf_ref, bf_ref, o_ref):
    # x_ref:  [tm, pack*S]      lane-packed tile of the (permuted, flattened) SE
    # wf_ref: [pack*S, pack*C]  block-diagonal fused weight (resident)
    # bf_ref: [1, pack*C]       tiled fused bias (resident)
    # o_ref:  [tm, pack*C]      lane-packed output (same HBM layout as [tm*pack, C])
    o_ref[...] = (
        jnp.dot(x_ref[...], wf_ref[...], preferred_element_type=jnp.float32)
        + bf_ref[...]
    ).astype(o_ref.dtype)


def se_embedding(SE, patterns, w1, b1, w2, b2, *, tm_packed=4096):
    """SE: [B, S, N, T]; patterns: [C, S]; w1,w2: [D, S]; b1,b2: [D] -> [B, T, N, C]."""
    B, S, N, T = SE.shape
    C, S2 = patterns.shape
    D = w1.shape[0]
    assert S2 == S and w1.shape == (D, S) and w2.shape == (D, S)
    assert b1.shape == (D,) and b2.shape == (D,)

    f32 = jnp.float32
    # ---- Grid-invariant algebraic fusion (done once, outside the kernel) ----
    P = patterns.astype(f32) @ w2.astype(f32).T + b2.astype(f32)   # [C, D]
    wf = w1.astype(f32).T @ P.T                                    # [S, C]
    bf = b1.astype(f32) @ P.T                                      # [C]

    # permute(0, 3, 2, 1): [B, S, N, T] -> [B, T, N, S], then flatten pixels.
    # TODO(synk): single remaining XLA transpose pass (see header note).
    x = jnp.transpose(SE, (0, 3, 2, 1)).reshape(B * T * N, S)
    M = x.shape[0]

    # ---- Lane packing: `pack` consecutive pixels per packed row ----
    pack = max(1, min(128 // max(S, 1), 128))
    if M % pack:
        # At most pack-1 dummy pixels; their (garbage) outputs are sliced off below.
        x = jnp.pad(x, ((0, pack - M % pack), (0, 0)))
    Mp = x.shape[0] // pack
    xp = x.reshape(Mp, pack * S)                                   # [Mp, ~128]

    wf_bd = jnp.kron(jnp.eye(pack, dtype=f32), wf)                 # [pack*S, pack*C]
    bf_p = jnp.tile(bf, pack).reshape(1, pack * C)                 # [1, pack*C]

    # ---- Tile over packed rows ----
    # Big tiles to amortize per-step overhead, >=2 grid steps when possible so
    # both v7x TensorCores get work; double-buffered VMEM stays under ~12-13MiB.
    tm = max(8, min(tm_packed, _round_up(pl.cdiv(Mp, 2), 8)))
    grid = (pl.cdiv(Mp, tm),)   # ragged last block handled by Pallas (no jnp.pad)

    out_p = pl.pallas_call(
        se_embedding_kernel,
        out_shape=jax.ShapeDtypeStruct((Mp, pack * C), SE.dtype),
        grid_spec=pltpu.PrefetchScalarGridSpec(
            num_scalar_prefetch=0,
            grid=grid,
            in_specs=[
                pl.BlockSpec((tm, pack * S), lambda i: (i, 0)),        # packed X tile
                pl.BlockSpec((pack * S, pack * C), lambda i: (0, 0)),  # resident weight
                pl.BlockSpec((1, pack * C), lambda i: (0, 0)),         # resident bias
            ],
            out_specs=pl.BlockSpec((tm, pack * C), lambda i: (i, 0)),
        ),
        compiler_params=pltpu.CompilerParams(
            dimension_semantics=("parallel",),
            vmem_limit_bytes=32 * 1024 * 1024,
        ),
    )(xp, wf_bd, bf_p)

    out = out_p.reshape(Mp * pack, C)
    if Mp * pack != M:
        out = out[:M]
    return out.reshape(B, T, N, C)


def se_embedding_reference(SE, patterns, w1, b1, w2, b2):
    """Pure-JAX reference mirroring the PyTorch forward."""
    conv = jnp.einsum('bsnt,ds->bdnt', SE, w1) + b1[None, :, None, None]
    se_p = jnp.transpose(conv, (0, 3, 2, 1))                 # [B, T, N, D]
    p = patterns @ w2.T + b2                                 # [C, D]
    return jnp.einsum('btnf,fc->btnc', se_p, p.T)            # [B, T, N, C]


if __name__ == "__main__":
    # Small, deterministic shapes consistent with the module.
    B, seq_len, N, T = 2, 8, 16, 4     # SE: [batch, seq_len, N, T]
    D = 32                             # embedding dim
    C = 16                             # number of patterns

    key = jax.random.PRNGKey(0)
    k_se, k_pat, k_w1, k_b1, k_w2, k_b2 = jax.random.split(key, 6)

    SE = jax.random.normal(k_se, (B, seq_len, N, T), dtype=jnp.float32)
    patterns = jax.random.normal(k_pat, (C, seq_len), dtype=jnp.float32)

    # Conv2d(seq_len, D, kernel_size=1): weight [D, seq_len, 1, 1] -> [D, seq_len]
    w1 = jax.random.normal(k_w1, (D, seq_len), dtype=jnp.float32) * 0.1
    b1 = jax.random.normal(k_b1, (D,), dtype=jnp.float32) * 0.1
    # Linear(seq_len, D): weight [D, seq_len]
    w2 = jax.random.normal(k_w2, (D, seq_len), dtype=jnp.float32) * 0.1
    b2 = jax.random.normal(k_b2, (D,), dtype=jnp.float32) * 0.1

    out = se_embedding(SE, patterns, w1, b1, w2, b2)
    out = jax.block_until_ready(out)

    ref = se_embedding_reference(SE, patterns, w1, b1, w2, b2)
    assert out.shape == (B, T, N, C), out.shape
    assert jnp.allclose(out, ref, atol=1e-4, rtol=1e-4), "mismatch vs reference"

    print("KERNEL_OK")
</pallas_src>

<mosaic_0001>
module attributes {stable_mosaic.version = 11 : i64} {
  func.func @se_embedding_kernel(%arg0: i32, %arg1: memref<8x128xf32, #tpu.memory_space<vmem>>, %arg2: memref<128x256xf32, #tpu.memory_space<vmem>>, %arg3: memref<1x256xf32, #tpu.memory_space<vmem>>, %arg4: memref<8x256xf32, #tpu.memory_space<vmem>>) attributes {dimension_semantics = [#tpu.dimension_semantics<parallel>], iteration_bounds = array<i64: 1>, scalar_prefetch = 0 : i64, scratch_operands = 0 : i64, tpu.core_type = #tpu.core_type<tc>, window_params = [{transform_indices = @transform_0, window_bounds = array<i64: 8, 128>}, {pipeline_mode = #tpu.pipeline_mode<synchronous>, transform_indices = @transform_1, window_bounds = array<i64: 128, 256>}, {pipeline_mode = #tpu.pipeline_mode<synchronous>, transform_indices = @transform_2, window_bounds = array<i64: 1, 256>}, {transform_indices = @transform_3, window_bounds = array<i64: 8, 256>}]} {
    %c0 = arith.constant 0 : index
    %c0_0 = arith.constant 0 : index
    %0 = vector.load %arg1[%c0, %c0_0] : memref<8x128xf32, #tpu.memory_space<vmem>>, vector<8x128xf32>
    %c0_1 = arith.constant 0 : index
    %c0_2 = arith.constant 0 : index
    %1 = vector.load %arg2[%c0_1, %c0_2] : memref<128x256xf32, #tpu.memory_space<vmem>>, vector<128x256xf32>
    %cst = arith.constant dense<0.000000e+00> : vector<8x256xf32>
    %2 = tpu.matmul %0, %1, %cst {dimension_numbers = #tpu.dot_dimension_numbers<[1], [0], [0], [1], [0, 0, 1, 1], [], []>} : vector<8x128xf32>, vector<128x256xf32>, vector<8x256xf32> -> vector<8x256xf32>
    %c0_3 = arith.constant 0 : index
    %c0_4 = arith.constant 0 : index
    %3 = vector.load %arg3[%c0_3, %c0_4] : memref<1x256xf32, #tpu.memory_space<vmem>>, vector<1x256xf32>
    %4 = vector.broadcast %3 : vector<1x256xf32> to vector<8x256xf32>
    %5 = arith.addf %2, %4 : vector<8x256xf32>
    %c0_5 = arith.constant 0 : index
    %c0_6 = arith.constant 0 : index
    %6 = vector.load %arg4[%c0_5, %c0_6] : memref<8x256xf32, #tpu.memory_space<vmem>>, vector<8x256xf32>
    tpu.vector_store %arg4[%c0_5, %c0_6], %5 {strides = array<i32>} : memref<8x256xf32, #tpu.memory_space<vmem>>, vector<8x256xf32>,
    return
  }
  func.func @transform_0(%arg0: i32) -> (i32, i32) {
    %c0_i32 = arith.constant 0 : i32
    %c0_i32_0 = arith.constant 0 : i32
    return %arg0, %c0_i32 : i32, i32
  }
  func.func @transform_1(%arg0: i32) -> (i32, i32) {
    %c0_i32 = arith.constant 0 : i32
    %c0_i32_0 = arith.constant 0 : i32
    %c0_i32_1 = arith.constant 0 : i32
    return %c0_i32, %c0_i32_0 : i32, i32
  }
  func.func @transform_2(%arg0: i32) -> (i32, i32) {
    %c0_i32 = arith.constant 0 : i32
    %c0_i32_0 = arith.constant 0 : i32
    %c0_i32_1 = arith.constant 0 : i32
    return %c0_i32, %c0_i32_0 : i32, i32
  }
  func.func @transform_3(%arg0: i32) -> (i32, i32) {
    %c0_i32 = arith.constant 0 : i32
    %c0_i32_0 = arith.constant 0 : i32
    return %arg0, %c0_i32 : i32, i32
  }
}

</mosaic_0001>

<bundles_post_ra>
// kernel: tpu_custom_call.1
= control target key start
LH: loop header
LB: loop body
LE: loop exit
PB: predicated region body
PF: predicated region fallthrough
CT: control target
= control target key end

     0   :  { %8 = vsyncpa [#allocation3], 0  ;;  %s303_s0 = inlined_call_operand.hbm [shape: f32[8,128], index: 0, kind: input, shape index: {}]   ;;  %s304_s1 = inlined_call_operand.hbm [shape: f32[128,256], index: 1, kind: input, shape index: {}]   ;;  %s305_s2 = inlined_call_operand.hbm [shape: f32[1,256], index: 2, kind: input, shape index: {}]   ;;  %s306_s3 = inlined_call_operand.hbm [shape: f32[8,256], index: 3, kind: output, shape index: {}]  }
   0x1   :  { %9 = vsyncpa [#allocation6], 0  ;;  %s26_s14 = sshll.u32 %s304_s1, 4  ;;  %s27_s14 = int_to_ptr.hbm [resolvable:$true] %s26_s14 }
   0x2   :  { %10 = vsyncpa [#allocation4], 0  ;;  %s265_s15 = smov [#allocation5]   ;;  %s16_s19 = sshll.u32 %s303_s0, 4  ;;  %s17_s19 = int_to_ptr.hbm [resolvable:$true] %s16_s19 }
   0x3   :  { %s28_s16 = sshll.u32 %s265_s15, 4  ;;  %s266_s20 = smov 256   ;;  %s29_s16 = int_to_ptr.vmem [resolvable:$true] %s28_s16 }
   0x4   :  { %s267_s21 = smov 16   ;;  %s268_s22 = smov [#allocation2]  }
   0x5   :  { %34 = dma.hbm_to_vmem [thread:$0]  %s27_s14, 4096, %s29_s16, [#allocation6], %s266_s20, %s266_s20, %s267_s21  }
   0x6   :  { %s18_s23 = sshll.u32 %s268_s22, 4  ;;  %s40_s26 = sshll.u32 %s305_s2, 4  ;;  %s19_s23 = int_to_ptr.vmem [resolvable:$true] %s18_s23  ;;  %s41_s26 = int_to_ptr.hbm [resolvable:$true] %s40_s26 }
   0x7   :  { %21 = dma.hbm_to_vmem [thread:$0]  %s17_s19, 128, %s19_s23, [#allocation3]  }
   0x8   :  { %s269_s1 = smov [#allocation7]  }
   0x9   :  { %s42_s27 = sshll.u32 %s269_s1, 4  ;;  %s43_s27 = int_to_ptr.vmem [resolvable:$true] %s42_s27 }
   0xa   :  { %45 = dma.hbm_to_vmem [thread:$0]  %s41_s26, 32, %s43_s27, [#allocation6]  }
   0xb   :  { %259 = dma.done.wait [#allocation3], 128  }
   0xc   :  { %260 = vsyncadd [#allocation3], 4294967168 }
   0xd   :  { %261 = dma.done.wait [#allocation6], 4128  }
   0xe   :  { %262 = vsyncadd [#allocation6], 4294963168  ;;  %v89_v0 = vld [vmem:[#allocation5 + $0xf0] sm:$0xff]  ;;  %v90_v1 = vld [vmem:[#allocation5 + $0xf8] sm:$0xff]  ;;  %s270_s0 = smov [#allocation8]   ;;  %s146_s30 = sshll.u32 %s306_s3, 4  ;;  %s147_s30 = int_to_ptr.hbm [resolvable:$true] %s146_s30 }
   0xf   :  { %v87_v2 = vld [vmem:[#allocation5 + $0xe0] sm:$0xff]  ;;  %97 = vmatpush.msra.mxu0 %v89_v0  ;;  %117 = vmatpush.msra.mxu1 %v90_v1  ;;  %v88_v3 = vld [vmem:[#allocation5 + $0xe8] sm:$0xff]  ;;  %v85_v4 = vld [vmem:[#allocation5 + $0xd0] sm:$0xff]  ;;  %s144_s2 = sshll.u32 %s270_s0, 4  ;;  %s145_s2 = int_to_ptr.vmem [resolvable:$true] %s144_s2 }
  0x10   :  { %v86_v5 = vld [vmem:[#allocation5 + $0xd8] sm:$0xff]  ;;  %v83_v6 = vld [vmem:[#allocation5 + $0xc0] sm:$0xff]  ;;  %v84_v7 = vld [vmem:[#allocation5 + $0xc8] sm:$0xff] }
  0x11   :  { %98 = vmatpush.msra.mxu0 %v87_v2  ;;  %118 = vmatpush.msra.mxu1 %v88_v3  ;;  %v81_v8 = vld [vmem:[#allocation5 + $0xb0] sm:$0xff]  ;;  %v82_v9 = vld [vmem:[#allocation5 + $0xb8] sm:$0xff]  ;;  %v79_v10 = vld [vmem:[#allocation5 + $0xa0] sm:$0xff] }
  0x12   :  { %v80_v11 = vld [vmem:[#allocation5 + $0xa8] sm:$0xff]  ;;  %v77_v12 = vld [vmem:[#allocation5 + $0x90] sm:$0xff]  ;;  %v78_v13 = vld [vmem:[#allocation5 + $0x98] sm:$0xff] }
  0x13   :  { %99 = vmatpush.msra.mxu0 %v85_v4  ;;  %119 = vmatpush.msra.mxu1 %v86_v5  ;;  %v75_v14 = vld [vmem:[#allocation5 + $0x80] sm:$0xff]  ;;  %v76_v15 = vld [vmem:[#allocation5 + $0x88] sm:$0xff]  ;;  %v73_v16 = vld [vmem:[#allocation5 + $0x70] sm:$0xff] }
  0x14   :  { %v74_v17 = vld [vmem:[#allocation5 + $0x78] sm:$0xff]  ;;  %v71_v18 = vld [vmem:[#allocation5 + $0x60] sm:$0xff]  ;;  %v72_v19 = vld [vmem:[#allocation5 + $0x68] sm:$0xff] }
  0x15   :  { %100 = vmatpush.msra.mxu0 %v83_v6  ;;  %120 = vmatpush.msra.mxu1 %v84_v7  ;;  %v69_v20 = vld [vmem:[#allocation5 + $0x50] sm:$0xff]  ;;  %v70_v21 = vld [vmem:[#allocation5 + $0x58] sm:$0xff]  ;;  %v67_v22 = vld [vmem:[#allocation5 + $0x40] sm:$0xff] }
  0x16   :  { %v68_v23 = vld [vmem:[#allocation5 + $0x48] sm:$0xff]  ;;  %v65_v24 = vld [vmem:[#allocation5 + $0x30] sm:$0xff]  ;;  %v66_v25 = vld [vmem:[#allocation5 + $0x38] sm:$0xff] }
  0x17   :  { %101 = vmatpush.msra.mxu0 %v81_v8  ;;  %121 = vmatpush.msra.mxu1 %v82_v9  ;;  %v63_v26 = vld [vmem:[#allocation5 + $0x20] sm:$0xff]  ;;  %v64_v27 = vld [vmem:[#allocation5 + $0x28] sm:$0xff]  ;;  %v61_v28 = vld [vmem:[#allocation5 + $0x10] sm:$0xff] }
  0x18   :  { %v62_v29 = vld [vmem:[#allocation5 + $0x18] sm:$0xff]  ;;  %v59_v30 = vld [vmem:[#allocation5] sm:$0xff]  ;;  %v60_v31 = vld [vmem:[#allocation5 + $0x8] sm:$0xff] }
  0x19   :  { %102 = vmatpush.msra.mxu0 %v79_v10  ;;  %122 = vmatpush.msra.mxu1 %v80_v11  ;;  %v58_v32 = vld [vmem:[#allocation2] sm:$0xff]  ;;  %v91_v33 = vld [vmem:[#allocation7] sm:$0x3] }
  0x1a   :  { %v93_v34 = vperm.slane %v91_v33, 0  ;;  %v94_v35 = vperm.slane %v91_v33, 1 }
  0x1b   :  { %103 = vmatpush.msra.mxu0 %v77_v12  ;;  %123 = vmatpush.msra.mxu1 %v78_v13 }
  0x1d   :  { %104 = vmatpush.msra.mxu0 %v75_v14  ;;  %124 = vmatpush.msra.mxu1 %v76_v15 }
  0x1f   :  { %105 = vmatpush.msra.mxu0 %v73_v16  ;;  %125 = vmatpush.msra.mxu1 %v74_v17 }
  0x21   :  { %106 = vmatpush.msra.mxu0 %v71_v18  ;;  %126 = vmatpush.msra.mxu1 %v72_v19 }
  0x23   :  { %107 = vmatpush.msra.mxu0 %v69_v20  ;;  %127 = vmatpush.msra.mxu1 %v70_v21 }
  0x25   :  { %108 = vmatpush.msra.mxu0 %v67_v22  ;;  %128 = vmatpush.msra.mxu1 %v68_v23 }
  0x27   :  { %109 = vmatpush.msra.mxu0 %v65_v24  ;;  %129 = vmatpush.msra.mxu1 %v66_v25 }
  0x29   :  { %110 = vmatpush.msra.mxu0 %v63_v26  ;;  %130 = vmatpush.msra.mxu1 %v64_v27 }
  0x2b   :  { %111 = vmatpush.msra.mxu0 %v61_v28  ;;  %131 = vmatpush.msra.mxu1 %v62_v29 }
  0x2d   :  { %112 = vmatpush.msra.mxu0 %v59_v30  ;;  %132 = vmatpush.msra.mxu1 %v60_v31 }
  0x2e   :  { %113 = vmatmul.f32.vlgmr.msra.gmra.mxu0 %v58_v32  ;;  %133 = vmatmul.f32.vlgmr.msra.gmra.mxu1 %v58_v32 }
  0xab   :  { %v114_v36 = vpop.f32.mrf.mxu0  ;;  %v134_v37 = vpop.f32.mrf.mxu1 }
  0xac   :  { %v115_v38 = vadd.f32 %v114_v36, %v93_v34  ;;  %v135_v39 = vadd.f32 %v134_v37, %v94_v35 }
  0xae   :  { %137 = vst [vmem:[#allocation8] sm:$0xff] %v115_v38 }
  0xaf   :  { %138 = vst [vmem:[#allocation8 + $0x8] sm:$0xff] %v135_v39 }
  0xb0   :  { %149 = dma.vmem_to_hbm [thread:$0]  %s145_s2, 256, %s147_s30, [#allocation4]  }
  0xb1   :  { %263 = dma.done.wait [#allocation4], 256  }
  0xb2   :  { %264 = vsyncadd [#allocation4], 4294967040 }
  0xb3   :  { %154 = vsyncpa [#allocation3], 1 }
  0xb4   :  { %155 = vsyncpa [#allocation6], 1 }
  0xb5   :  { %156 = vsyncpa [#allocation4], 1 }

</bundles_post_ra>
